<compile_context>
chip_gen: v7x
topology: tpu7x:2x2x1
jax: 0.10.0
libtpu: 0.0.40
codegen_flags: <defaults>
</compile_context>

<pallas_src>
import functools

import jax
import jax.numpy as jnp
from jax.experimental import pallas as pl
from jax.experimental.pallas import tpu as pltpu

BN_EPS = 1e-5
ACT_DTYPE = jnp.bfloat16          # inter-layer MXU-operand dtype (accum stays f32)


# --------------------------------------------------------------------------- #
# shared in-kernel math
# --------------------------------------------------------------------------- #
def _bn_relu(z, gamma, beta):
    """Training-mode BatchNorm2d + ReLU on a [M, C] pre-activation (stats over M).

    Centered variance; all elementwise math f32; rsqrt goes to the EUP.
    """
    inv_m = 1.0 / z.shape[0]
    mean = jnp.sum(z, axis=0, keepdims=True) * inv_m            # [1, C]
    zc = z - mean
    var = jnp.sum(zc * zc, axis=0, keepdims=True) * inv_m       # centered, biased
    scale = gamma * jax.lax.rsqrt(var + BN_EPS)                 # EUP rsqrt
    return jnp.maximum(zc * scale + beta, 0.0)


# --------------------------------------------------------------------------- #
# fused whole-M path (all layers in one pallas_call, activations stay in VMEM)
# --------------------------------------------------------------------------- #
def _make_fused_kernel(num_feats, num_layers):
    def kernel(*refs):
        feat_refs = refs[:num_feats]
        o_ref = refs[-1]
        prm = refs[num_feats:-1]

        idx = 0
        # Layer 0: the (xyz, points) channel concat is never materialized --
        # the first conv weight is split row-wise, the two MXU partials summed.
        z = None
        for f_ref in feat_refs:
            part = jnp.dot(f_ref[...], prm[idx][...],
                           preferred_element_type=jnp.float32)
            idx += 1
            z = part if z is None else z + part
        h = _bn_relu(z, prm[idx][...], prm[idx + 1][...])
        idx += 2

        # Layers 1..L-1: activations stay VMEM-resident; bf16 into the MXU.
        for _ in range(1, num_layers):
            z = jnp.dot(h.astype(ACT_DTYPE), prm[idx][...],
                        preferred_element_type=jnp.float32)
            h = _bn_relu(z, prm[idx + 1][...], prm[idx + 2][...])
            idx += 3

        o_ref[...] = h.astype(o_ref.dtype)

    return kernel


def _fused_mlp(feats, layer_params, out_dtype, vmem_limit):
    M = feats[0].shape[0]
    c_last = layer_params[-1][0].shape[1] if len(layer_params) > 1 else \
        layer_params[0][0][0].shape[1]

    args = list(feats)
    w0_pieces, g0, b0 = layer_params[0]
    args.extend(w0_pieces)
    args.extend([g0, b0])
    for (w, g, b) in layer_params[1:]:
        args.extend([w, g, b])
        c_last = w.shape[1]

    kernel = _make_fused_kernel(len(feats), len(layer_params))
    return pl.pallas_call(
        kernel,
        out_shape=jax.ShapeDtypeStruct((M, c_last), out_dtype),
        in_specs=[pl.BlockSpec(a.shape, lambda: (0, 0)) for a in args],
        out_specs=pl.BlockSpec((M, c_last), lambda: (0, 0)),
        compiler_params=pltpu.CompilerParams(vmem_limit_bytes=int(vmem_limit)),
    )(*args)


# --------------------------------------------------------------------------- #
# M-tiled two-pass fallback (per layer: stats sweep, then apply sweep)
# --------------------------------------------------------------------------- #
def _make_tiled_stats_kernel(num_feats):
    def kernel(*refs):
        feat_refs = refs[:num_feats]
        w_refs = refs[num_feats:2 * num_feats]
        sum_ref, ssq_ref = refs[2 * num_feats], refs[2 * num_feats + 1]

        @pl.when(pl.program_id(0) == 0)
        def _():
            sum_ref[...] = jnp.zeros_like(sum_ref)
            ssq_ref[...] = jnp.zeros_like(ssq_ref)

        z = None
        for f_ref, w_ref in zip(feat_refs, w_refs):
            part = jnp.dot(f_ref[...], w_ref[...],
                           preferred_element_type=jnp.float32)
            z = part if z is None else z + part
        sum_ref[...] += jnp.sum(z, axis=0, keepdims=True)
        ssq_ref[...] += jnp.sum(z * z, axis=0, keepdims=True)

    return kernel


def _make_tiled_apply_kernel(num_feats):
    def kernel(*refs):
        feat_refs = refs[:num_feats]
        w_refs = refs[num_feats:2 * num_feats]
        scale_ref, shift_ref = refs[2 * num_feats], refs[2 * num_feats + 1]
        o_ref = refs[-1]

        z = None
        for f_ref, w_ref in zip(feat_refs, w_refs):
            part = jnp.dot(f_ref[...], w_ref[...],
                           preferred_element_type=jnp.float32)
            z = part if z is None else z + part
        o_ref[...] = jnp.maximum(z * scale_ref[...] + shift_ref[...],
                                 0.0).astype(o_ref.dtype)

    return kernel


def _tiled_layer(feats, w_list, gamma, beta, out_dtype, tile_m):
    """One conv1x1 + BN(train) + ReLU layer as two M-tiled sweeps.

    Pass 1 accumulates per-channel sum / sum-of-squares of the pre-activation
    (the conv is recomputed in pass 2 instead of round-tripping z through HBM,
    so HBM traffic per layer is 2 reads of h + 1 write of h_next).
    Pass 2 applies the folded BN + ReLU; it is megacore-parallel over M.
    """
    M = feats[0].shape[0]
    c_out = w_list[0].shape[1]
    nf = len(feats)
    grid = (M // tile_m,)

    feat_specs = [pl.BlockSpec((tile_m, f.shape[1]), lambda i: (i, 0)) for f in feats]
    w_specs = [pl.BlockSpec(w.shape, lambda i: (0, 0)) for w in w_list]
    vec_spec = pl.BlockSpec((1, c_out), lambda i: (0, 0))

    zsum, zssq = pl.pallas_call(
        _make_tiled_stats_kernel(nf),
        out_shape=(jax.ShapeDtypeStruct((1, c_out), jnp.float32),
                   jax.ShapeDtypeStruct((1, c_out), jnp.float32)),
        grid=grid,
        in_specs=feat_specs + w_specs,
        out_specs=(vec_spec, vec_spec),
        compiler_params=pltpu.CompilerParams(
            dimension_semantics=("arbitrary",)),
    )(*feats, *w_list)

    # Tiny [1, C] math; uncentered variance (clamped) on the fallback path only.
    mean = zsum / M
    var = jnp.maximum(zssq / M - mean * mean, 0.0)
    scale = gamma * jax.lax.rsqrt(var + BN_EPS)
    shift = beta - mean * scale

    return pl.pallas_call(
        _make_tiled_apply_kernel(nf),
        out_shape=jax.ShapeDtypeStruct((M, c_out), out_dtype),
        grid=grid,
        in_specs=feat_specs + w_specs + [vec_spec, vec_spec],
        out_specs=pl.BlockSpec((tile_m, c_out), lambda i: (i, 0)),
        compiler_params=pltpu.CompilerParams(
            dimension_semantics=("parallel",)),            # both TCs on v7x
    )(*feats, *w_list, scale, shift)


def _tiled_mlp(feats, layer_params, out_dtype, tile_m):
    n_layers = len(layer_params)
    w0_pieces, g0, b0 = layer_params[0]
    h = _tiled_layer(feats, list(w0_pieces), g0, b0,
                     out_dtype if n_layers == 1 else ACT_DTYPE, tile_m)
    for l, (w, g, b) in enumerate(layer_params[1:], start=1):
        dt = out_dtype if l == n_layers - 1 else ACT_DTYPE
        h = _tiled_layer([h], [w], g, b, dt, tile_m)
    return h


# --------------------------------------------------------------------------- #
# dispatch: param prep, VMEM budgeting, fused-vs-tiled decision
# --------------------------------------------------------------------------- #
def _prepare_params(params, feat_channels):
    """params: [(w [Cout, Cin], gamma [Cout], beta [Cout])] mirroring the module.

    Layer 0's weight is transposed to [Cin, Cout] and split row-wise to match
    the separate xyz / points inputs; layer>=1 weights are transposed and cast
    to the bf16 MXU-operand dtype.  gamma/beta become [1, Cout] f32 rows.
    """
    out = []
    w0, g0, b0 = params[0]
    w0t = jnp.transpose(w0).astype(jnp.float32)
    pieces, row = [], 0
    for c in feat_channels:
        pieces.append(w0t[row:row + c, :])
        row += c
    out.append((pieces,
                g0.reshape(1, -1).astype(jnp.float32),
                b0.reshape(1, -1).astype(jnp.float32)))
    for (w, g, b) in params[1:]:
        out.append((jnp.transpose(w).astype(ACT_DTYPE),
                    g.reshape(1, -1).astype(jnp.float32),
                    b.reshape(1, -1).astype(jnp.float32)))
    return out


def _usable_vmem_bytes():
    try:
        cap = int(pltpu.get_tpu_info().vmem_capacity_bytes)
    except Exception:
        cap = 64 << 20                    # conservative (v7x-sized) fallback
    return int(cap * 0.82)                # headroom for Mosaic internal scratch


def _fused_vmem_peak(M, feat_channels, mlp_channels, out_dtype):
    f32b = 4
    actb = jnp.dtype(ACT_DTYPE).itemsize
    outb = jnp.dtype(out_dtype).itemsize
    inputs = M * sum(feat_channels) * f32b
    output = M * mlp_channels[-1] * outb
    peak_layer, prev_c, prev_b = 0, 0, 0   # layer-0 operands are the inputs above
    for c in mlp_channels:
        live = M * (prev_c * prev_b + 2 * c * f32b + c * actb)   # h_{l-1}, z, zc
        peak_layer = max(peak_layer, live)
        prev_c, prev_b = c, actb
    return int(1.25 * (inputs + output + peak_layer)) + (4 << 20)


def _pick_tile_m(M):
    for t in (4096, 2048, 1024, 512, 256, 128, 64, 32, 16, 8):
        if M % t == 0:
            return t
    return M


def _mlp_forward(feats, params, out_dtype, force_tiled, tile_m):
    M = feats[0].shape[0]
    feat_channels = [f.shape[1] for f in feats]
    mlp_channels = [w.shape[0] for (w, _, _) in params]
    layer_params = _prepare_params(params, feat_channels)

    usable = _usable_vmem_bytes()
    peak = _fused_vmem_peak(M, feat_channels, mlp_channels, out_dtype)
    if force_tiled or peak > usable:
        t = tile_m if (tile_m is not None and M % tile_m == 0) else _pick_tile_m(M)
        return _tiled_mlp(feats, layer_params, out_dtype, t)
    return _fused_mlp(feats, layer_params, out_dtype, vmem_limit=usable)


# --------------------------------------------------------------------------- #
# module-level API
# --------------------------------------------------------------------------- #
def init_params(key, in_channel, mlp):
    """Conv2d(last, out, 1) weight as [out, last] + BatchNorm2d gamma/beta [out].

    The conv bias is omitted on purpose: training-mode BatchNorm subtracts the
    per-channel batch mean right after the conv, so a constant per-channel bias
    cancels exactly (zero change to the forward output).
    """
    params = []
    last = in_channel
    for out_channel in mlp:
        key, kw, kg, kb = jax.random.split(key, 4)
        w = 0.1 * jax.random.normal(kw, (out_channel, last), jnp.float32)
        g = 1.0 + 0.1 * jax.random.normal(kg, (out_channel,), jnp.float32)
        b = 0.1 * jax.random.normal(kb, (out_channel,), jnp.float32)
        params.append((w, g, b))
        last = out_channel
    return params


@functools.partial(jax.jit,
                   static_argnames=("npoint", "out_dtype", "force_tiled", "tile_m"))
def pointnet_set_abstraction(xyz, points, params, npoint,
                             out_dtype=jnp.float32, force_tiled=False, tile_m=None):
    """Forward of PointNetSetAbstraction (the branch its forward executes).

    xyz: [B, N, 3]; points: [B, N, D] or None.
    Returns (new_xyz [B, npoint, 3], new_points [B, N, mlp[-1]]).
    """
    B, N, _ = xyz.shape
    M = B * N
    new_xyz = xyz[:, :npoint, :]

    # Point-major [M, C] layout: plain reshapes, no transpose / pad / cast copies.
    feats = [xyz.reshape(M, 3).astype(jnp.float32)]
    if points is not None:
        feats.append(points.reshape(M, points.shape[-1]).astype(jnp.float32))

    out = _mlp_forward(feats, params, out_dtype, force_tiled, tile_m)  # [M, C_last]
    c_last = params[-1][0].shape[0]
    return new_xyz, out.reshape(B, N, c_last)


# --------------------------------------------------------------------------- #
# pure-JAX reference (same math as the PyTorch module in training mode)
# --------------------------------------------------------------------------- #
def _reference(xyz, points, params, npoint):
    new_xyz = xyz[:, :npoint, :]
    x = jnp.concatenate([xyz, points], axis=-1) if points is not None else xyz
    B, N, C = x.shape
    h = x.reshape(B * N, C)
    for (w, g, b) in params:
        z = jnp.dot(h, w.T, precision=jax.lax.Precision.HIGHEST)
        mean = jnp.mean(z, axis=0, keepdims=True)
        var = jnp.mean((z - mean) ** 2, axis=0, keepdims=True)
        h = jnp.maximum((z - mean) * jax.lax.rsqrt(var + BN_EPS) * g + b, 0.0)
    return new_xyz, h.reshape(B, N, -1)


if __name__ == "__main__":
    # Small shapes consistent with the module's forward.
    B, N, D = 2, 16, 13
    npoint = 8                       # radius / nsample are unused by this forward
    in_channel = 3 + D
    mlp = [32, 64]

    key = jax.random.PRNGKey(0)
    k_xyz, k_pts, k_par, k_par2 = jax.random.split(key, 4)
    xyz = jax.random.normal(k_xyz, (B, N, 3), jnp.float32)
    points = jax.random.normal(k_pts, (B, N, D), jnp.float32)
    params = init_params(k_par, in_channel, mlp)

    # 1) Fused single-pass path (default).
    new_xyz, new_points = pointnet_set_abstraction(xyz, points, params, npoint)
    jax.block_until_ready((new_xyz, new_points))
    assert new_xyz.shape == (B, npoint, 3)
    assert new_points.shape == (B, N, mlp[-1])

    ref_xyz, ref_points = _reference(xyz, points, params, npoint)
    assert jnp.allclose(new_xyz, ref_xyz)
    err = float(jnp.max(jnp.abs(new_points - ref_points)))
    assert jnp.allclose(new_points, ref_points, atol=2e-2, rtol=2e-2), err

    # 2) Per-layer M-tiled two-pass fallback (forced, to exercise that path).
    _, tiled_points = pointnet_set_abstraction(xyz, points, params, npoint,
                                               force_tiled=True, tile_m=8)
    jax.block_until_ready(tiled_points)
    terr = float(jnp.max(jnp.abs(tiled_points - ref_points)))
    assert jnp.allclose(tiled_points, ref_points, atol=2e-2, rtol=2e-2), terr

    # 3) points=None branch of the module's forward.
    params_xyz_only = init_params(k_par2, 3, [16])
    nx2, np2 = pointnet_set_abstraction(xyz, None, params_xyz_only, npoint)
    jax.block_until_ready(np2)
    _, r_np2 = _reference(xyz, None, params_xyz_only, npoint)
    assert np2.shape == (B, N, 16)
    assert jnp.allclose(np2, r_np2, atol=2e-2, rtol=2e-2)

    print("KERNEL_OK")
</pallas_src>

<mosaic_0001>
module attributes {stable_mosaic.version = 11 : i64} {
  func.func @kernel(%arg0: memref<32x3xf32, #tpu.memory_space<vmem>>, %arg1: memref<32x13xf32, #tpu.memory_space<vmem>>, %arg2: memref<3x32xf32, #tpu.memory_space<vmem>>, %arg3: memref<13x32xf32, #tpu.memory_space<vmem>>, %arg4: memref<1x32xf32, #tpu.memory_space<vmem>>, %arg5: memref<1x32xf32, #tpu.memory_space<vmem>>, %arg6: memref<32x64xbf16, #tpu.memory_space<vmem>>, %arg7: memref<1x64xf32, #tpu.memory_space<vmem>>, %arg8: memref<1x64xf32, #tpu.memory_space<vmem>>, %arg9: memref<32x64xf32, #tpu.memory_space<vmem>>) attributes {dimension_semantics = [], scalar_prefetch = 0 : i64, scratch_operands = 0 : i64, tpu.core_type = #tpu.core_type<tc>} {
    %c0 = arith.constant 0 : index
    %c0_0 = arith.constant 0 : index
    %0 = vector.load %arg0[%c0, %c0_0] : memref<32x3xf32, #tpu.memory_space<vmem>>, vector<32x3xf32>
    %c0_1 = arith.constant 0 : index
    %c0_2 = arith.constant 0 : index
    %1 = vector.load %arg2[%c0_1, %c0_2] : memref<3x32xf32, #tpu.memory_space<vmem>>, vector<3x32xf32>
    %cst = arith.constant dense<0.000000e+00> : vector<32x32xf32>
    %2 = tpu.matmul %0, %1, %cst {dimension_numbers = #tpu.dot_dimension_numbers<[1], [0], [0], [1], [0, 0, 1, 1], [], []>} : vector<32x3xf32>, vector<3x32xf32>, vector<32x32xf32> -> vector<32x32xf32>
    %c0_3 = arith.constant 0 : index
    %c0_4 = arith.constant 0 : index
    %3 = vector.load %arg1[%c0_3, %c0_4] : memref<32x13xf32, #tpu.memory_space<vmem>>, vector<32x13xf32>
    %c0_5 = arith.constant 0 : index
    %c0_6 = arith.constant 0 : index
    %4 = vector.load %arg3[%c0_5, %c0_6] : memref<13x32xf32, #tpu.memory_space<vmem>>, vector<13x32xf32>
    %cst_7 = arith.constant dense<0.000000e+00> : vector<32x32xf32>
    %5 = tpu.matmul %3, %4, %cst_7 {dimension_numbers = #tpu.dot_dimension_numbers<[1], [0], [0], [1], [0, 0, 1, 1], [], []>} : vector<32x13xf32>, vector<13x32xf32>, vector<32x32xf32> -> vector<32x32xf32>
    %6 = arith.addf %2, %5 : vector<32x32xf32>
    %c0_8 = arith.constant 0 : index
    %c0_9 = arith.constant 0 : index
    %7 = vector.load %arg4[%c0_8, %c0_9] : memref<1x32xf32, #tpu.memory_space<vmem>>, vector<1x32xf32>
    %c0_10 = arith.constant 0 : index
    %c0_11 = arith.constant 0 : index
    %8 = vector.load %arg5[%c0_10, %c0_11] : memref<1x32xf32, #tpu.memory_space<vmem>>, vector<1x32xf32>
    %cst_12 = arith.constant dense<0.000000e+00> : vector<32xf32>
    %9 = vector.multi_reduction <add>, %6, %cst_12 [0] : vector<32x32xf32> to vector<32xf32>
    %10 = vector.shape_cast %9 : vector<32xf32> to vector<1x32xf32>
    %cst_13 = arith.constant 3.125000e-02 : f32
    %11 = vector.broadcast %cst_13 : f32 to vector<1x32xf32>
    %12 = arith.mulf %10, %11 : vector<1x32xf32>
    %13 = vector.broadcast %12 : vector<1x32xf32> to vector<32x32xf32>
    %14 = arith.subf %6, %13 : vector<32x32xf32>
    %15 = arith.mulf %14, %14 : vector<32x32xf32>
    %cst_14 = arith.constant dense<0.000000e+00> : vector<32xf32>
    %16 = vector.multi_reduction <add>, %15, %cst_14 [0] : vector<32x32xf32> to vector<32xf32>
    %17 = vector.shape_cast %16 : vector<32xf32> to vector<1x32xf32>
    %cst_15 = arith.constant 3.125000e-02 : f32
    %18 = vector.broadcast %cst_15 : f32 to vector<1x32xf32>
    %19 = arith.mulf %17, %18 : vector<1x32xf32>
    %cst_16 = arith.constant 9.99999974E-6 : f32
    %20 = vector.broadcast %cst_16 : f32 to vector<1x32xf32>
    %21 = arith.addf %19, %20 : vector<1x32xf32>
    %22 = math.rsqrt %21 : vector<1x32xf32>
    %23 = arith.mulf %7, %22 : vector<1x32xf32>
    %24 = vector.broadcast %23 : vector<1x32xf32> to vector<32x32xf32>
    %25 = arith.mulf %14, %24 : vector<32x32xf32>
    %26 = vector.broadcast %8 : vector<1x32xf32> to vector<32x32xf32>
    %27 = arith.addf %25, %26 : vector<32x32xf32>
    %cst_17 = arith.constant 0.000000e+00 : f32
    %28 = vector.broadcast %cst_17 : f32 to vector<32x32xf32>
    %29 = arith.maximumf %27, %28 : vector<32x32xf32>
    %30 = arith.truncf %29 : vector<32x32xf32> to vector<32x32xbf16>
    %c0_18 = arith.constant 0 : index
    %c0_19 = arith.constant 0 : index
    %31 = vector.load %arg6[%c0_18, %c0_19] : memref<32x64xbf16, #tpu.memory_space<vmem>>, vector<32x64xbf16>
    %cst_20 = arith.constant dense<0.000000e+00> : vector<32x64xf32>
    %32 = tpu.matmul %30, %31, %cst_20 {dimension_numbers = #tpu.dot_dimension_numbers<[1], [0], [0], [1], [0, 0, 1, 1], [], []>} : vector<32x32xbf16>, vector<32x64xbf16>, vector<32x64xf32> -> vector<32x64xf32>
    %c0_21 = arith.constant 0 : index
    %c0_22 = arith.constant 0 : index
    %33 = vector.load %arg7[%c0_21, %c0_22] : memref<1x64xf32, #tpu.memory_space<vmem>>, vector<1x64xf32>
    %c0_23 = arith.constant 0 : index
    %c0_24 = arith.constant 0 : index
    %34 = vector.load %arg8[%c0_23, %c0_24] : memref<1x64xf32, #tpu.memory_space<vmem>>, vector<1x64xf32>
    %cst_25 = arith.constant dense<0.000000e+00> : vector<64xf32>
    %35 = vector.multi_reduction <add>, %32, %cst_25 [0] : vector<32x64xf32> to vector<64xf32>
    %36 = vector.shape_cast %35 : vector<64xf32> to vector<1x64xf32>
    %cst_26 = arith.constant 3.125000e-02 : f32
    %37 = vector.broadcast %cst_26 : f32 to vector<1x64xf32>
    %38 = arith.mulf %36, %37 : vector<1x64xf32>
    %39 = vector.broadcast %38 : vector<1x64xf32> to vector<32x64xf32>
    %40 = arith.subf %32, %39 : vector<32x64xf32>
    %41 = arith.mulf %40, %40 : vector<32x64xf32>
    %cst_27 = arith.constant dense<0.000000e+00> : vector<64xf32>
    %42 = vector.multi_reduction <add>, %41, %cst_27 [0] : vector<32x64xf32> to vector<64xf32>
    %43 = vector.shape_cast %42 : vector<64xf32> to vector<1x64xf32>
    %cst_28 = arith.constant 3.125000e-02 : f32
    %44 = vector.broadcast %cst_28 : f32 to vector<1x64xf32>
    %45 = arith.mulf %43, %44 : vector<1x64xf32>
    %cst_29 = arith.constant 9.99999974E-6 : f32
    %46 = vector.broadcast %cst_29 : f32 to vector<1x64xf32>
    %47 = arith.addf %45, %46 : vector<1x64xf32>
    %48 = math.rsqrt %47 : vector<1x64xf32>
    %49 = arith.mulf %33, %48 : vector<1x64xf32>
    %50 = vector.broadcast %49 : vector<1x64xf32> to vector<32x64xf32>
    %51 = arith.mulf %40, %50 : vector<32x64xf32>
    %52 = vector.broadcast %34 : vector<1x64xf32> to vector<32x64xf32>
    %53 = arith.addf %51, %52 : vector<32x64xf32>
    %cst_30 = arith.constant 0.000000e+00 : f32
    %54 = vector.broadcast %cst_30 : f32 to vector<32x64xf32>
    %55 = arith.maximumf %53, %54 : vector<32x64xf32>
    %c0_31 = arith.constant 0 : index
    %c0_32 = arith.constant 0 : index
    %56 = vector.load %arg9[%c0_31, %c0_32] : memref<32x64xf32, #tpu.memory_space<vmem>>, vector<32x64xf32>
    tpu.vector_store %arg9[%c0_31, %c0_32], %55 {strides = array<i32>} : memref<32x64xf32, #tpu.memory_space<vmem>>, vector<32x64xf32>,
    return
  }
}

</mosaic_0001>

<bundles_post_ra>
// kernel: pointnet_set_abstraction.1
= control target key start
LH: loop header
LB: loop body
LE: loop exit
PB: predicated region body
PF: predicated region fallthrough
CT: control target
= control target key end

     0   :  { %vm58_vm0 = vcmask 1044480   ;;  %vm160_vm1 = vcmask 1042432   ;;  %vm575_vm2 = vmmov 1   ;;  %vm147_vm4 = vcmask 23552   ;;  %s729_s0 = inlined_call_operand.vmem [shape: f32[32,3], index: 0, kind: input, shape index: {}]   ;;  %s730_s1 = inlined_call_operand.vmem [shape: f32[32,13], index: 1, kind: input, shape index: {}]   ;;  %s731_s2 = inlined_call_operand.vmem [shape: f32[3,32], index: 2, kind: input, shape index: {}]   ;;  %s732_s3 = inlined_call_operand.vmem [shape: f32[13,32], index: 3, kind: input, shape index: {}]   ;;  %s733_s4 = inlined_call_operand.vmem [shape: f32[1,32], index: 4, kind: input, shape index: {}]   ;;  %s734_s5 = inlined_call_operand.vmem [shape: f32[1,32], index: 5, kind: input, shape index: {}]   ;;  %s735_s6 = inlined_call_operand.vmem [shape: bf16[32,64], index: 6, kind: input, shape index: {}]   ;;  %s736_s7 = inlined_call_operand.vmem [shape: f32[1,64], index: 7, kind: input, shape index: {}]   ;;  %s737_s8 = inlined_call_operand.vmem [shape: f32[1,64], index: 8, kind: input, shape index: {}]   ;;  %s738_s9 = inlined_call_operand.hbm [shape: f32[32,64], index: 9, kind: output, shape index: {}]  }
   0x1   :  { %v43_v0 = vld [vmem:[%s732_s3] sm:$0xff]  ;;  %v44_v1 = vld [vmem:[%s732_s3 + $0x8] sm:$0x1f]  ;;  %vm532_vm3 = vmpackc.low %vm58_vm0, %vm575_vm2  ;;  %vm45_vm5 = vcmask 105472  }
   0x2   :  { %v531_v2 = vpack.c.bf16 %v44_v1, %v43_v0  ;;  %v38_v3 = vld [vmem:[%s731_s2] sm:$0x7]  ;;  %v35_v6 = vld [vmem:[%s729_s0 + $0x8] sm:$0xff]  ;;  %v36_v8 = vld [vmem:[%s729_s0 + $0x10] sm:$0xff] }
   0x3   :  { %v34_v4 = vld [vmem:[%s729_s0] sm:$0xff]  ;;  %515 = vmatprep.subr.msk.mxu1 %vm160_vm1, %v38_v3  ;;  %v40_v7 = vld [vmem:[%s730_s1 + $0x8] sm:$0xff]  ;;  %v41_v9 = vld [vmem:[%s730_s1 + $0x10] sm:$0xff] }
   0x4   :  { %517 = vmatprep.mubr.msk.f32.mxu1 %vm147_vm4, %v34_v4  ;;  %v39_v5 = vld [vmem:[%s730_s1] sm:$0xff]  ;;  %533 = vmatprep.subr.msk.bf16.mxu0 %vm532_vm3, %v531_v2 }
   0x5   :  { %516 = vmatpush3.msk.msra.mxu1 %vm160_vm1, %v38_v3  ;;  %536 = vmatpush3.bf16.msk.msra.mxu0 %vm532_vm3, %v531_v2 }
   0x6   :  { %509 = vmatprep.mubr.msk.f32.mxu0 %vm45_vm5, %v39_v5  ;;  %518 = vmatmul.mubr.msk.f32.vlgmr.msra.gmra.mrb[0].mxu1 %vm147_vm4, %v35_v6 }
   0x7   :  { %14 = vsyncpa [#allocation3], 0  ;;  %520 = vmatprep.mubr.msk.f32.mxu1 %vm147_vm4, %v36_v8  ;;  %v37_v10 = vld [vmem:[%s729_s0 + $0x18] sm:$0xff]  ;;  %v545_v12 = vld [vmem:[%s735_s6] sm:$0xff]   ;;  %vm251_vm6 = vcmask 261120   ;;  %v292_v63 = vlaneseq  ;;  %vm390_vm7 = vcmask 523264  }
   0x8   :  { %510 = vmatmul.mubr.msk.f32.vlgmr.msra.gmra.mrb[0].mxu0 %vm45_vm5, %v40_v7  ;;  %v42_v11 = vld [vmem:[%s730_s1 + $0x18] sm:$0xff]  ;;  %523 = vmatprep.subr.bf16.mxu1 %v545_v12  ;;  %v546_v13 = vld [vmem:[%s735_s6 + $0x8] sm:$0xff]   ;;  %v249_v1 = vld [vmem:[%s733_s4] sm:$0x1]  ;;  %s576_s15 = smov [#allocation2]  }
   0x9   :  { %512 = vmatprep.mubr.msk.f32.mxu0 %vm45_vm5, %v41_v9  ;;  %524 = vmatpush3.bf16.msra.mxu1 %v545_v12  ;;  %v684_v0 = vshrl.u32 %v292_v63, 7  ;;  %v484_v6 = vld [vmem:[%s734_s5] ss:$0 sm:$0xff]  ;;  %s463_s16 = sshll.u32 %s576_s15, 4  ;;  %s464_s16 = int_to_ptr.vmem [resolvable:$true] %s463_s16 }
   0xa   :  { %521 = vmatmul.mubr.msk.f32.gmra.mrb[2].mxu1 %vm147_vm4, %v37_v10  ;;  %525 = vmatprep.subr.bf16.mxu1 %v546_v13  ;;  %p556_p1 = scmp.lt.s32.totalorder %s464_s16, %s464_s16 }
   0xb   :  { %v294_v2 = vsub.s32 0, %v684_v0 }
   0xc   :  { %513 = vmatmul.mubr.msk.f32.gmra.mrb[2].mxu0 %vm45_vm5, %v42_v11 }
   0xd   :  { %526 = vmatpush3.bf16.msra.mxu1 %v546_v13 }
  0xd9   :  { %v519_v14 = vpop.f32.mrb[0].mxu1 }
  0xda   :  { %v230_v15 = vpop.f32.mrb[1].mxu1 }
  0xdb   :  { %v511_v16 = vpop.f32.mrb[0].mxu0 }
  0xdc   :  { %v236_v17 = vadd.f32 %v519_v14, %v511_v16  ;;  %v128_v18 = vpop.f32.mrb[1].mxu0 }
  0xdd   :  { %v231_v19 = vadd.f32 %v230_v15, %v128_v18  ;;  %v522_v20 = vpop.f32.mrb[2].mxu1 }
  0xde   :  { %v253_v21 = vsel %vm251_vm6, %v236_v17, 0.0  ;;  %v240_v22 = vpop.f32.mrb[3].mxu1 }
  0xdf   :  { %v252_v23 = vsel %vm251_vm6, %v231_v19, 0.0  ;;  %v514_v24 = vpop.f32.mrb[2].mxu0 }
  0xe0   :  { %v254_v25 = vadd.f32 %v253_v21, %v252_v23  ;;  %v246_v26 = vadd.f32 %v522_v20, %v514_v24  ;;  %v138_v27 = vpop.f32.mrb[3].mxu0 }
  0xe1   :  { %v241_v28 = vadd.f32 %v240_v22, %v138_v27 }
  0xe2   :  { %v257_v31 = vsel %vm251_vm6, %v246_v26, 0.0 }
  0xe3   :  { %v255_v29 = vsel %vm251_vm6, %v241_v28, 0.0 }
  0xe4   :  { %v256_v30 = vadd.f32 %v255_v29, %v254_v25 }
  0xe6   :  { %v258_v32 = vadd.f32 %v257_v31, %v256_v30 }
  0xe8   :  { %v259_v33 = vrot.slane %v258_v32, 4 }
  0xea   :  { %v260_v34 = vadd.f32 %v259_v33, %v258_v32 }
  0xec   :  { %v261_v35 = vrot.slane %v260_v34, 2 }
  0xee   :  { %v262_v36 = vadd.f32 %v261_v35, %v260_v34 }
  0xf0   :  { %v263_v37 = vrot.slane %v262_v36, 1 }
  0xf2   :  { %v264_v38 = vadd.f32 %v263_v37, %v262_v36 }
  0xf4   :  { %v265_v39 = vmul.f32 0.03125, %v264_v38 }
  0xf6   :  { %v266_v40 = vsub.f32 %v231_v19, %v265_v39  ;;  %v267_v41 = vsub.f32 %v236_v17, %v265_v39  ;;  %v268_v42 = vsub.f32 %v241_v28, %v265_v39  ;;  %v269_v43 = vsub.f32 %v246_v26, %v265_v39 }
  0xf8   :  { %v270_v44 = vmul.f32 %v266_v40, %v266_v40  ;;  %v271_v45 = vmul.f32 %v267_v41, %v267_v41  ;;  %v272_v46 = vmul.f32 %v268_v42, %v268_v42  ;;  %v273_v47 = vmul.f32 %v269_v43, %v269_v43 }
  0xfa   :  { %v274_v48 = vsel %vm251_vm6, %v270_v44, 0.0  ;;  %v275_v49 = vsel %vm251_vm6, %v271_v45, 0.0  ;;  %v277_v51 = vsel %vm251_vm6, %v272_v46, 0.0  ;;  %v279_v53 = vsel %vm251_vm6, %v273_v47, 0.0 }
  0xfb   :  { %v276_v50 = vadd.f32 %v275_v49, %v274_v48 }
  0xfd   :  { %v278_v52 = vadd.f32 %v277_v51, %v276_v50 }
  0xff   :  { %v280_v54 = vadd.f32 %v279_v53, %v278_v52 }
 0x101   :  { %v281_v55 = vrot.slane %v280_v54, 4 }
 0x103   :  { %v282_v56 = vadd.f32 %v281_v55, %v280_v54 }
 0x105   :  { %v283_v57 = vrot.slane %v282_v56, 2 }
 0x107   :  { %v284_v58 = vadd.f32 %v283_v57, %v282_v56 }
 0x109   :  { %v285_v59 = vrot.slane %v284_v58, 1 }
 0x10b   :  { %v286_v60 = vadd.f32 %v285_v59, %v284_v58 }
 0x10d   :  { %v287_v61 = vmul.f32 0.03125, %v286_v60 }
 0x10f   :  { %v288_v62 = vadd.f32 1e-05, %v287_v61 }
 0x111   :  { %547 = vrsqrt.f32 %v288_v62  ;;  %v388_v62 = vld [vmem:[%s736_s7] sm:$0x1]  ;;  %s551_s7 = scalar_lea.vmem %s464_s16, 512 }
 0x112   :  { %p552_p0 = scmp.ne.s32.totalorder %s464_s16, %s551_s7  ;;  %p557_p2 = scmp.lt.s32.totalorder %s551_s7, %s551_s7 }
 0x114   :  { %p558_p3 = por %p557_p2, %p556_p1 }
 0x116   :  { %p559_p4 = pnand %p558_p3, %p552_p0 }
 0x11b   :  { %v548_v3 = vpop.eup %547 }
 0x11c   :  { %v290_v4 = vmul.f32 %v548_v3, %v249_v1 }
 0x11e   :  { %v295_v5 = vrot.slane %v290_v4, %v294_v2  ;;  %v489_v4 = vld [vmem:[%s737_s8] ss:$0 sm:$0xff] }
 0x120   :  { %v299_v7 = vmul.f32 %v295_v5, %v268_v42  ;;  %v300_v8 = vmul.f32 %v295_v5, %v269_v43  ;;  %v297_v9 = vmul.f32 %v295_v5, %v266_v40  ;;  %v298_v10 = vmul.f32 %v295_v5, %v267_v41 }
 0x122   :  { %v309_v11 = vadd.f32 %v484_v6, %v299_v7  ;;  %v310_v12 = vadd.f32 %v484_v6, %v300_v8  ;;  %v307_v13 = vadd.f32 %v484_v6, %v297_v9  ;;  %v308_v14 = vadd.f32 %v484_v6, %v298_v10 }
 0x124   :  { %v313_v15 = vmax.f32 %v309_v11, 0.0  ;;  %v314_v16 = vmax.f32 %v310_v12, 0.0  ;;  %v311_v17 = vmax.f32 %v307_v13, 0.0  ;;  %v312_v18 = vmax.f32 %v308_v14, 0.0 }
 0x126   :  { %v316_v19 = vpack.c.bf16 %v314_v16, %v313_v15  ;;  %v315_v20 = vpack.c.bf16 %v312_v18, %v311_v17 }
 0x128   :  { %527 = vmatprep.mubr.msk.bf16.mxu1 %vm251_vm6, %v315_v20 }
 0x129   :  { %528 = vmatmul.mubr.msk.bf16.vlgmr.msra.gmra.mrb[4].mxu1 %vm251_vm6, %v316_v19 }
 0x1fc   :  { %v529_v21 = vpop.f32.mrb[4].mxu1 }
 0x1fd   :  { %v373_v22 = vpop.f32.mrb[5].mxu1  ;;  %v394_v28 = vsel %vm390_vm7, %v529_v21, 0.0 }
 0x1fe   :  { %v530_v23 = vpop.f32.mrb[6].mxu1  ;;  %v391_v25 = vsel %vm390_vm7, %v373_v22, 0.0 }
 0x1ff   :  { %v376_v24 = vpop.f32.mrb[7].mxu1  ;;  %v396_v30 = vsel %vm390_vm7, %v530_v23, 0.0 }
 0x200   :  { %v392_v26 = vsel %vm390_vm7, %v376_v24, 0.0 }
 0x201   :  { %v393_v27 = vadd.f32 %v392_v26, %v391_v25 }
 0x203   :  { %v395_v29 = vadd.f32 %v394_v28, %v393_v27 }
 0x205   :  { %v397_v31 = vadd.f32 %v396_v30, %v395_v29 }
 0x207   :  { %v398_v32 = vrot.slane %v397_v31, 4 }
 0x209   :  { %v399_v33 = vadd.f32 %v398_v32, %v397_v31 }
 0x20b   :  { %v400_v34 = vrot.slane %v399_v33, 2 }
 0x20d   :  { %v401_v35 = vadd.f32 %v400_v34, %v399_v33 }
 0x20f   :  { %v402_v36 = vrot.slane %v401_v35, 1 }
 0x211   :  { %v403_v37 = vadd.f32 %v402_v36, %v401_v35 }
 0x213   :  { %v404_v38 = vmul.f32 0.03125, %v403_v37 }
 0x215   :  { %v405_v39 = vsub.f32 %v373_v22, %v404_v38  ;;  %v406_v40 = vsub.f32 %v376_v24, %v404_v38  ;;  %v407_v41 = vsub.f32 %v529_v21, %v404_v38  ;;  %v408_v42 = vsub.f32 %v530_v23, %v404_v38 }
 0x217   :  { %v409_v43 = vmul.f32 %v405_v39, %v405_v39  ;;  %v410_v44 = vmul.f32 %v406_v40, %v406_v40  ;;  %v411_v45 = vmul.f32 %v407_v41, %v407_v41  ;;  %v412_v46 = vmul.f32 %v408_v42, %v408_v42 }
 0x219   :  { %v413_v47 = vsel %vm390_vm7, %v409_v43, 0.0  ;;  %v414_v48 = vsel %vm390_vm7, %v410_v44, 0.0  ;;  %v416_v50 = vsel %vm390_vm7, %v411_v45, 0.0  ;;  %v418_v52 = vsel %vm390_vm7, %v412_v46, 0.0 }
 0x21a   :  { %v415_v49 = vadd.f32 %v414_v48, %v413_v47 }
 0x21c   :  { %v417_v51 = vadd.f32 %v416_v50, %v415_v49 }
 0x21e   :  { %v419_v53 = vadd.f32 %v418_v52, %v417_v51 }
 0x220   :  { %v420_v54 = vrot.slane %v419_v53, 4 }
 0x222   :  { %v421_v55 = vadd.f32 %v420_v54, %v419_v53 }
 0x224   :  { %v422_v56 = vrot.slane %v421_v55, 2 }
 0x226   :  { %v423_v57 = vadd.f32 %v422_v56, %v421_v55 }
 0x228   :  { %v424_v58 = vrot.slane %v423_v57, 1 }
 0x22a   :  { %v425_v59 = vadd.f32 %v424_v58, %v423_v57 }
 0x22c   :  { %v426_v60 = vmul.f32 0.03125, %v425_v59 }
 0x22e   :  { %v427_v61 = vadd.f32 1e-05, %v426_v60 }
 0x230   :  { %549 = vrsqrt.f32 %v427_v61 }
 0x23a   :  { %v550_v63 = vpop.eup %549 }
 0x23b   :  { %v429_v1 = vmul.f32 %v550_v63, %v388_v62 }
 0x23d   :  { %v434_v3 = vrot.slane %v429_v1, %v294_v2 }
 0x23f   :  { %v436_v5 = vmul.f32 %v434_v3, %v405_v39  ;;  %v437_v6 = vmul.f32 %v434_v3, %v406_v40  ;;  %v438_v7 = vmul.f32 %v434_v3, %v407_v41  ;;  %v439_v8 = vmul.f32 %v434_v3, %v408_v42 }
 0x241   :  { %v446_v9 = vadd.f32 %v489_v4, %v436_v5  ;;  %v447_v10 = vadd.f32 %v489_v4, %v437_v6  ;;  %v448_v11 = vadd.f32 %v489_v4, %v438_v7  ;;  %v449_v12 = vadd.f32 %v489_v4, %v439_v8 }
 0x243   :  { %v450_v13 = vmax.f32 %v446_v9, 0.0  ;;  %v451_v14 = vmax.f32 %v447_v10, 0.0  ;;  %v452_v15 = vmax.f32 %v448_v11, 0.0  ;;  %v453_v0 = vmax.f32 %v449_v12, 0.0 }
 0x245   :  { %454 = vst.msk [vmem:[#allocation2] sm:$0xff] %vm390_vm7, %v450_v13  ;;  %455 = vst.msk [vmem:[#allocation2 + $0x8] sm:$0xff] %vm390_vm7, %v451_v14 }
 0x246   :  { %456 = vst.msk [vmem:[#allocation2 + $0x10] sm:$0xff] %vm390_vm7, %v452_v15  ;;  %457 = vst.msk [vmem:[#allocation2 + $0x18] sm:$0xff] %vm390_vm7, %v453_v0 }
 0x247   :  { %562 = shalt.err (!%p559_p4)
}
 0x248   :  { %s563_s3 = scalar_lea.hbm %s738_s9, 512 }
 0x249   :  { %p564_p5 = scmp.ne.s32.totalorder %s738_s9, %s563_s3  ;;  %p567_p6 = scmp.lt.u32.totalorder %s563_s3, %s738_s9 }
 0x24b   :  { %p569_p7 = pnand %p567_p6, %p564_p5 }
 0x24d   :  { %572 = shalt.err (!%p569_p7)
}
 0x24e   :  { %s577_s21 = smov 128   ;;  %s578_s22 = smov 8  }
 0x24f   :  { %469 = dma.vmem_to_hbm [thread:$0]  %s464_s16, 512, %s738_s9, [#allocation3], %s577_s21, %s577_s21, %s578_s22  }
 0x250   :  { %573 = dma.done.wait [#allocation3], 512  }
 0x251   :  { %574 = vsyncadd [#allocation3], 4294966784 }
 0x252   :  { %473 = vsyncpa [#allocation3], 1 }

</bundles_post_ra>
